<compile_context>
chip_gen: v7x
topology: tpu7x:2x2x1
jax: 0.10.0
libtpu: 0.0.40
codegen_flags: <defaults>
</compile_context>

<pallas_src>
import functools

import jax
import jax.numpy as jnp
from jax.experimental import pallas as pl
from jax.experimental.pallas import tpu as pltpu

LANE = 128
_TARGET_TILE_BYTES = 2 * 1024 * 1024   # per-input VMEM tile (x2 inputs x2 bufs = 8 MiB)


def _dice_partial_kernel(x_ref, t_ref, o_it_ref, o_st_ref, acc_it, acc_st, *,
                         block_rows, rows_total, blocks_per_core, need_mask):
    """Per-core partial sums [sum(sig(x)*t), sum(sig(x)+t)].

    Grid is (n_par, blocks_per_core): axis 0 is "parallel" (one TensorCore per
    index on multi-core chips), axis 1 walks this core's contiguous chunk of
    row-blocks.  Tiny (1,128) VMEM accumulators stay resident across axis 1;
    the cross-lane reduce and output store happen once, on the last step.
    """
    c = pl.program_id(0)
    j = pl.program_id(1)

    @pl.when(j == 0)
    def _init():
        acc_it[...] = jnp.zeros_like(acc_it)
        acc_st[...] = jnp.zeros_like(acc_st)

    x = x_ref[...].astype(jnp.float32)
    t = t_ref[...].astype(jnp.float32)
    # sigmoid(x) = 0.5*tanh(0.5*x)+0.5: transcendental on the EUP, no divide.
    s = 0.5 * jnp.tanh(0.5 * x) + 0.5

    def _accumulate(s_v, t_v):
        # Column reduce (VALU vadds + one in-vreg sublane reduce) -> (1, 128);
        # a single tiny += per step instead of full-block accumulator stores.
        acc_it[...] += jnp.sum(s_v * t_v, axis=0, keepdims=True)
        acc_st[...] += jnp.sum(s_v + t_v, axis=0, keepdims=True)

    if need_mask:
        lb = c * blocks_per_core + j               # logical block index
        is_edge = (lb + 1) * block_rows > rows_total

        @pl.when(jnp.logical_not(is_edge))
        def _full():
            _accumulate(s, t)

        @pl.when(is_edge)
        def _masked():
            # Rows past the logical extent (partial last block, or the
            # duplicated overhang block on core 1) contribute exactly zero.
            row_ids = lb * block_rows + jax.lax.broadcasted_iota(
                jnp.int32, (block_rows, LANE), 0)
            valid = row_ids < rows_total
            _accumulate(jnp.where(valid, s, 0.0), jnp.where(valid, t, 0.0))
    else:
        _accumulate(s, t)

    @pl.when(j == blocks_per_core - 1)
    def _finalize():
        o_it_ref[...] = jnp.full(o_it_ref.shape, jnp.sum(acc_it[...]),
                                 jnp.float32)
        o_st_ref[...] = jnp.full(o_st_ref.shape, jnp.sum(acc_st[...]),
                                 jnp.float32)


def _dice_sums_pallas(x2, t2, rows, block_rows):
    """Run the Pallas kernel over the (rows, LANE) views; return (I, S+T)."""
    total_blocks = pl.cdiv(rows, block_rows)
    # Always split across 2 cores when there are >= 2 blocks (v7x megacore);
    # on single-core chips the size-2 "parallel" axis just runs sequentially.
    n_par = 2 if total_blocks >= 2 else 1
    blocks_per_core = pl.cdiv(total_blocks, n_par)
    need_mask = (rows % block_rows != 0) or (n_par * blocks_per_core != total_blocks)

    def in_map(c, j):
        lb = c * blocks_per_core + j
        # Clamp: the duplicated overhang block on core 1 re-reads the last real
        # block and is fully zeroed by the in-kernel row mask.
        return (jnp.minimum(lb, total_blocks - 1), 0)

    kernel = functools.partial(
        _dice_partial_kernel,
        block_rows=block_rows,
        rows_total=rows,
        blocks_per_core=blocks_per_core,
        need_mask=need_mask,
    )

    out_tile = jax.ShapeDtypeStruct((n_par, 8, LANE), jnp.float32)
    out_spec = pl.BlockSpec((1, 8, LANE), lambda c, j: (c, 0, 0))

    out_it, out_st = pl.pallas_call(
        kernel,
        out_shape=(out_tile, out_tile),
        grid=(n_par, blocks_per_core),
        in_specs=[
            pl.BlockSpec((block_rows, LANE), in_map),
            pl.BlockSpec((block_rows, LANE), in_map),
        ],
        out_specs=(out_spec, out_spec),
        scratch_shapes=[pltpu.VMEM((1, LANE), jnp.float32)] * 2,
        compiler_params=pltpu.CompilerParams(
            dimension_semantics=("parallel", "arbitrary"),
            vmem_limit_bytes=32 * 1024 * 1024),
    )(x2, t2)

    intersection = jnp.sum(out_it[:, 0, 0])
    st_sum = jnp.sum(out_st[:, 0, 0])
    return intersection, st_sum


def dice_loss(inputs, targets, smooth=1.0, block_rows_cap=None):
    """Pallas implementation of DiceLoss.forward (matches the PyTorch module)."""
    x = inputs.reshape(-1)
    t = targets.reshape(-1)
    n = x.shape[0]

    rows = n // LANE
    bulk = rows * LANE

    intersection = jnp.float32(0.0)
    st_sum = jnp.float32(0.0)

    if rows > 0:
        if block_rows_cap is None:
            itemsize = max(jnp.dtype(inputs.dtype).itemsize,
                           jnp.dtype(targets.dtype).itemsize)
            block_rows_cap = max(8, (_TARGET_TILE_BYTES // (LANE * itemsize)) // 8 * 8)
        block_rows = rows if rows <= block_rows_cap else block_rows_cap

        # TODO(synk): when n % 128 != 0 this slice materializes a copy of the
        # bulk; streaming the flat array through an ANY-space ref with manual
        # DMA + lane masking would remove that extra HBM traffic.
        xb = x if bulk == n else jax.lax.slice(x, (0,), (bulk,))
        tb = t if bulk == n else jax.lax.slice(t, (0,), (bulk,))
        x2 = xb.reshape(rows, LANE)    # contiguous reshape: no copy
        t2 = tb.reshape(rows, LANE)

        it, st = _dice_sums_pallas(x2, t2, rows, block_rows)
        intersection += it
        st_sum += st

    if bulk < n:
        # Remainder of fewer than 128 elements: plain-JAX glue.
        xt = x[bulk:].astype(jnp.float32)
        tt = t[bulk:].astype(jnp.float32)
        stail = jax.nn.sigmoid(xt)
        intersection += jnp.sum(stail * tt)
        st_sum += jnp.sum(stail) + jnp.sum(tt)

    dice = (2.0 * intersection + smooth) / (st_sum + smooth)
    return 1.0 - dice


def dice_loss_ref(inputs, targets, smooth=1.0):
    """Pure-JAX reference mirroring the PyTorch forward."""
    s = jax.nn.sigmoid(inputs.reshape(-1).astype(jnp.float32))
    t = targets.reshape(-1).astype(jnp.float32)
    intersection = jnp.sum(s * t)
    dice = (2.0 * intersection + smooth) / (jnp.sum(s) + jnp.sum(t) + smooth)
    return 1.0 - dice


if __name__ == "__main__":
    key = jax.random.PRNGKey(0)
    k1, k2, k3, k4 = jax.random.split(key, 4)

    # Primary case: NCHW logits + binary targets, small shapes.
    B, C, H, W = 2, 4, 16, 16
    inputs = jax.random.normal(k1, (B, C, H, W), dtype=jnp.float32)
    targets = jax.random.bernoulli(k2, 0.5, (B, C, H, W)).astype(jnp.float32)

    loss = jax.block_until_ready(dice_loss(inputs, targets, smooth=1.0))
    ref = dice_loss_ref(inputs, targets, smooth=1.0)
    assert jnp.allclose(loss, ref, rtol=1e-5, atol=1e-5), (loss, ref)

    # Exercise multi-block + 2-core split + partial-block mask + <128 tail
    # (tiny block cap keeps the array small).
    n2 = 53 * LANE + 37
    x_b = jax.random.normal(k3, (n2,), dtype=jnp.float32)
    t_b = jax.random.bernoulli(k4, 0.5, (n2,)).astype(jnp.float32)
    loss2 = jax.block_until_ready(dice_loss(x_b, t_b, smooth=1.0, block_rows_cap=16))
    ref2 = dice_loss_ref(x_b, t_b, smooth=1.0)
    assert jnp.allclose(loss2, ref2, rtol=1e-5, atol=1e-5), (loss2, ref2)

    # Odd block count -> duplicated (fully masked) overhang block on core 1.
    n3 = 40 * LANE
    x_c = jax.random.normal(k3, (n3,), dtype=jnp.float32)
    t_c = jax.random.bernoulli(k4, 0.5, (n3,)).astype(jnp.float32)
    loss3 = jax.block_until_ready(dice_loss(x_c, t_c, smooth=1.0, block_rows_cap=16))
    ref3 = dice_loss_ref(x_c, t_c, smooth=1.0)
    assert jnp.allclose(loss3, ref3, rtol=1e-5, atol=1e-5), (loss3, ref3)

    print("KERNEL_OK")
</pallas_src>

<mosaic_0001>
module attributes {stable_mosaic.version = 11 : i64} {
  func.func @_dice_partial_kernel(%arg0: i32, %arg1: i32, %arg2: memref<16x128xf32, #tpu.memory_space<vmem>>, %arg3: memref<16x128xf32, #tpu.memory_space<vmem>>, %arg4: memref<1x8x128xf32, #tpu.memory_space<vmem>>, %arg5: memref<1x8x128xf32, #tpu.memory_space<vmem>>, %arg6: memref<1x128xf32, #tpu.memory_space<vmem>>, %arg7: memref<1x128xf32, #tpu.memory_space<vmem>>) attributes {dimension_semantics = [#tpu.dimension_semantics<parallel>, #tpu.dimension_semantics<arbitrary>], iteration_bounds = array<i64: 1, 1>, scalar_prefetch = 0 : i64, scratch_operands = 2 : i64, tpu.core_type = #tpu.core_type<tc>, window_params = [{transform_indices = @transform_0, window_bounds = array<i64: 16, 128>}, {transform_indices = @transform_1, window_bounds = array<i64: 16, 128>}, {transform_indices = @transform_2, window_bounds = array<i64: 1, 8, 128>}, {transform_indices = @transform_3, window_bounds = array<i64: 1, 8, 128>}]} {
    %c0_i32 = arith.constant 0 : i32
    %0 = arith.cmpi eq, %arg1, %c0_i32 : i32
    %1 = arith.extui %0 : i1 to i32
    %c0_i32_0 = arith.constant 0 : i32
    %2 = arith.cmpi ne, %1, %c0_i32_0 : i32
    scf.if %2 {
      %cst_18 = arith.constant 0.000000e+00 : f32
      %27 = vector.broadcast %cst_18 : f32 to vector<1x128xf32>
      %c0_19 = arith.constant 0 : index
      %c0_20 = arith.constant 0 : index
      %28 = vector.load %arg6[%c0_19, %c0_20] : memref<1x128xf32, #tpu.memory_space<vmem>>, vector<1x128xf32>
      tpu.vector_store %arg6[%c0_19, %c0_20], %27 {strides = array<i32>} : memref<1x128xf32, #tpu.memory_space<vmem>>, vector<1x128xf32>,
      %cst_21 = arith.constant 0.000000e+00 : f32
      %29 = vector.broadcast %cst_21 : f32 to vector<1x128xf32>
      %c0_22 = arith.constant 0 : index
      %c0_23 = arith.constant 0 : index
      %30 = vector.load %arg7[%c0_22, %c0_23] : memref<1x128xf32, #tpu.memory_space<vmem>>, vector<1x128xf32>
      tpu.vector_store %arg7[%c0_22, %c0_23], %29 {strides = array<i32>} : memref<1x128xf32, #tpu.memory_space<vmem>>, vector<1x128xf32>,
    } else {
    }
    %c0 = arith.constant 0 : index
    %c0_1 = arith.constant 0 : index
    %3 = vector.load %arg2[%c0, %c0_1] : memref<16x128xf32, #tpu.memory_space<vmem>>, vector<16x128xf32>
    %c0_2 = arith.constant 0 : index
    %c0_3 = arith.constant 0 : index
    %4 = vector.load %arg3[%c0_2, %c0_3] : memref<16x128xf32, #tpu.memory_space<vmem>>, vector<16x128xf32>
    %cst = arith.constant 5.000000e-01 : f32
    %5 = vector.broadcast %cst : f32 to vector<16x128xf32>
    %6 = arith.mulf %5, %3 : vector<16x128xf32>
    %7 = math.tanh %6 : vector<16x128xf32>
    %cst_4 = arith.constant 5.000000e-01 : f32
    %8 = vector.broadcast %cst_4 : f32 to vector<16x128xf32>
    %9 = arith.mulf %8, %7 : vector<16x128xf32>
    %cst_5 = arith.constant 5.000000e-01 : f32
    %10 = vector.broadcast %cst_5 : f32 to vector<16x128xf32>
    %11 = arith.addf %9, %10 : vector<16x128xf32>
    %c0_6 = arith.constant 0 : index
    %c0_7 = arith.constant 0 : index
    %12 = vector.load %arg6[%c0_6, %c0_7] : memref<1x128xf32, #tpu.memory_space<vmem>>, vector<1x128xf32>
    %13 = arith.mulf %11, %4 : vector<16x128xf32>
    %cst_8 = arith.constant dense<0.000000e+00> : vector<128xf32>
    %14 = vector.multi_reduction <add>, %13, %cst_8 [0] : vector<16x128xf32> to vector<128xf32>
    %15 = vector.shape_cast %14 : vector<128xf32> to vector<1x128xf32>
    %16 = arith.addf %12, %15 : vector<1x128xf32>
    %c0_9 = arith.constant 0 : index
    %c0_10 = arith.constant 0 : index
    %17 = vector.load %arg6[%c0_9, %c0_10] : memref<1x128xf32, #tpu.memory_space<vmem>>, vector<1x128xf32>
    tpu.vector_store %arg6[%c0_9, %c0_10], %16 {strides = array<i32>} : memref<1x128xf32, #tpu.memory_space<vmem>>, vector<1x128xf32>,
    %c0_11 = arith.constant 0 : index
    %c0_12 = arith.constant 0 : index
    %18 = vector.load %arg7[%c0_11, %c0_12] : memref<1x128xf32, #tpu.memory_space<vmem>>, vector<1x128xf32>
    %19 = arith.addf %11, %4 : vector<16x128xf32>
    %cst_13 = arith.constant dense<0.000000e+00> : vector<128xf32>
    %20 = vector.multi_reduction <add>, %19, %cst_13 [0] : vector<16x128xf32> to vector<128xf32>
    %21 = vector.shape_cast %20 : vector<128xf32> to vector<1x128xf32>
    %22 = arith.addf %18, %21 : vector<1x128xf32>
    %c0_14 = arith.constant 0 : index
    %c0_15 = arith.constant 0 : index
    %23 = vector.load %arg7[%c0_14, %c0_15] : memref<1x128xf32, #tpu.memory_space<vmem>>, vector<1x128xf32>
    tpu.vector_store %arg7[%c0_14, %c0_15], %22 {strides = array<i32>} : memref<1x128xf32, #tpu.memory_space<vmem>>, vector<1x128xf32>,
    %c0_i32_16 = arith.constant 0 : i32
    %24 = arith.cmpi eq, %arg1, %c0_i32_16 : i32
    %25 = arith.extui %24 : i1 to i32
    %c0_i32_17 = arith.constant 0 : i32
    %26 = arith.cmpi ne, %25, %c0_i32_17 : i32
    scf.if %26 {
      %c0_18 = arith.constant 0 : index
      %c0_19 = arith.constant 0 : index
      %27 = vector.load %arg6[%c0_18, %c0_19] : memref<1x128xf32, #tpu.memory_space<vmem>>, vector<1x128xf32>
      %28 = vector.shape_cast %27 : vector<1x128xf32> to vector<1x1x128xf32>
      %cst_20 = arith.constant dense<0.000000e+00> : vector<1xf32>
      %29 = vector.multi_reduction <add>, %28, %cst_20 [1, 2] : vector<1x1x128xf32> to vector<1xf32>
      %30 = vector.shape_cast %29 : vector<1xf32> to vector<1x1x1xf32>
      %31 = vector.extract %30[0, 0, 0] : f32 from vector<1x1x1xf32>
      %32 = vector.broadcast %31 : f32 to vector<1x8x128xf32>
      %c0_21 = arith.constant 0 : index
      %c0_22 = arith.constant 0 : index
      %c0_23 = arith.constant 0 : index
      %33 = vector.load %arg4[%c0_21, %c0_22, %c0_23] : memref<1x8x128xf32, #tpu.memory_space<vmem>>, vector<1x8x128xf32>
      tpu.vector_store %arg4[%c0_21, %c0_22, %c0_23], %32 {strides = array<i32>} : memref<1x8x128xf32, #tpu.memory_space<vmem>>, vector<1x8x128xf32>,
      %c0_24 = arith.constant 0 : index
      %c0_25 = arith.constant 0 : index
      %34 = vector.load %arg7[%c0_24, %c0_25] : memref<1x128xf32, #tpu.memory_space<vmem>>, vector<1x128xf32>
      %35 = vector.shape_cast %34 : vector<1x128xf32> to vector<1x1x128xf32>
      %cst_26 = arith.constant dense<0.000000e+00> : vector<1xf32>
      %36 = vector.multi_reduction <add>, %35, %cst_26 [1, 2] : vector<1x1x128xf32> to vector<1xf32>
      %37 = vector.shape_cast %36 : vector<1xf32> to vector<1x1x1xf32>
      %38 = vector.extract %37[0, 0, 0] : f32 from vector<1x1x1xf32>
      %39 = vector.broadcast %38 : f32 to vector<1x8x128xf32>
      %c0_27 = arith.constant 0 : index
      %c0_28 = arith.constant 0 : index
      %c0_29 = arith.constant 0 : index
      %40 = vector.load %arg5[%c0_27, %c0_28, %c0_29] : memref<1x8x128xf32, #tpu.memory_space<vmem>>, vector<1x8x128xf32>
      tpu.vector_store %arg5[%c0_27, %c0_28, %c0_29], %39 {strides = array<i32>} : memref<1x8x128xf32, #tpu.memory_space<vmem>>, vector<1x8x128xf32>,
    } else {
    }
    return
  }
  func.func @transform_0(%arg0: i32, %arg1: i32) -> (i32, i32) {
    %c1_i32 = arith.constant 1 : i32
    %0 = arith.muli %arg0, %c1_i32 : i32
    %1 = arith.addi %0, %arg1 : i32
    %c0_i32 = arith.constant 0 : i32
    %2 = arith.minsi %1, %c0_i32 : i32
    %c0_i32_0 = arith.constant 0 : i32
    %c0_i32_1 = arith.constant 0 : i32
    return %2, %c0_i32_0 : i32, i32
  }
  func.func @transform_1(%arg0: i32, %arg1: i32) -> (i32, i32) {
    %c1_i32 = arith.constant 1 : i32
    %0 = arith.muli %arg0, %c1_i32 : i32
    %1 = arith.addi %0, %arg1 : i32
    %c0_i32 = arith.constant 0 : i32
    %2 = arith.minsi %1, %c0_i32 : i32
    %c0_i32_0 = arith.constant 0 : i32
    %c0_i32_1 = arith.constant 0 : i32
    return %2, %c0_i32_0 : i32, i32
  }
  func.func @transform_2(%arg0: i32, %arg1: i32) -> (i32, i32, i32) {
    %c0_i32 = arith.constant 0 : i32
    %c0_i32_0 = arith.constant 0 : i32
    %c0_i32_1 = arith.constant 0 : i32
    return %arg0, %c0_i32, %c0_i32_0 : i32, i32, i32
  }
  func.func @transform_3(%arg0: i32, %arg1: i32) -> (i32, i32, i32) {
    %c0_i32 = arith.constant 0 : i32
    %c0_i32_0 = arith.constant 0 : i32
    %c0_i32_1 = arith.constant 0 : i32
    return %arg0, %c0_i32, %c0_i32_0 : i32, i32, i32
  }
}

</mosaic_0001>

<bundles_post_ra>
// kernel: tpu_custom_call.1
= control target key start
LH: loop header
LB: loop body
LE: loop exit
PB: predicated region body
PF: predicated region fallthrough
CT: control target
= control target key end

     0   :  { %9 = vsyncpa [#allocation5], 0  ;;  %s355_s0 = inlined_call_operand.hbm [shape: f32[16,128], index: 0, kind: input, shape index: {}]   ;;  %s356_s1 = inlined_call_operand.hbm [shape: f32[16,128], index: 1, kind: input, shape index: {}]   ;;  %s357_s2 = inlined_call_operand.hbm [shape: f32[1,8,128], index: 2, kind: output, shape index: {0}]   ;;  %s358_s3 = inlined_call_operand.hbm [shape: f32[1,8,128], index: 3, kind: output, shape index: {1}]  }
   0x1   :  { %10 = vsyncpa [#allocation8], 0 }
   0x2   :  { %11 = vsyncpa [#allocation6], 0 }
   0x3   :  { %12 = vsyncpa [#allocation11], 0  ;;  %s280_s12 = smov [#allocation4]   ;;  %s184_s16 = scalar_lea.hbm %s355_s0, 256 }
   0x4   :  { %s24_s13 = sshll.u32 %s280_s12, 4  ;;  %p185_p0 = scmp.ne.s32.totalorder %s355_s0, %s184_s16  ;;  %s25_s13 = int_to_ptr.vmem [resolvable:$true] %s24_s13 }
   0x5   :  { %p188_p1 = scmp.lt.u32.totalorder %s184_s16, %s355_s0 }
   0x7   :  { %p190_p2 = pnand %p188_p1, %p185_p0 }
   0x9   :  { %193 = shalt.err (!%p190_p2)
}
   0xa   :  { %s194_s21 = scalar_lea.vmem %s25_s13, 256  ;;  %p199_p4 = scmp.lt.s32.totalorder %s25_s13, %s25_s13 }
   0xb   :  { %p195_p3 = scmp.ne.s32.totalorder %s25_s13, %s194_s21  ;;  %p200_p5 = scmp.lt.s32.totalorder %s194_s21, %s194_s21 }
   0xd   :  { %p201_p6 = por %p200_p5, %p199_p4 }
   0xf   :  { %p202_p7 = pnand %p201_p6, %p195_p3 }
  0x11   :  { %205 = shalt.err (!%p202_p7)
}
  0x12   :  { %s281_s22 = smov 128   ;;  %s282_s23 = smov 8  }
  0x13   :  { %30 = dma.hbm_to_vmem [thread:$0]  %s355_s0, 256, %s25_s13, [#allocation5], %s281_s22, %s281_s22, %s282_s23  }
  0x14   :  { %s283_s26 = smov [#allocation7]   ;;  %s206_s30 = scalar_lea.hbm %s356_s1, 256 }
  0x15   :  { %s42_s27 = sshll.u32 %s283_s26, 4  ;;  %p207_p8 = scmp.ne.s32.totalorder %s356_s1, %s206_s30  ;;  %s43_s27 = int_to_ptr.vmem [resolvable:$true] %s42_s27 }
  0x16   :  { %p210_p9 = scmp.lt.u32.totalorder %s206_s30, %s356_s1 }
  0x18   :  { %p212_p10 = pnand %p210_p9, %p207_p8 }
  0x1a   :  { %215 = shalt.err (!%p212_p10)
}
  0x1b   :  { %s216_s8 = scalar_lea.vmem %s43_s27, 256  ;;  %p221_p12 = scmp.lt.s32.totalorder %s43_s27, %s43_s27 }
  0x1c   :  { %p217_p11 = scmp.ne.s32.totalorder %s43_s27, %s216_s8  ;;  %p222_p13 = scmp.lt.s32.totalorder %s216_s8, %s216_s8 }
  0x1e   :  { %p223_p0 = por %p222_p13, %p221_p12 }
  0x20   :  { %p224_p1 = pnand %p223_p0, %p217_p11 }
  0x22   :  { %227 = shalt.err (!%p224_p1)
}
  0x23   :  { %48 = dma.hbm_to_vmem [thread:$0]  %s356_s1, 256, %s43_s27, [#allocation8], %s281_s22, %s281_s22, %s282_s23  }
  0x24   :  { %272 = dma.done.wait [#allocation5], 256  }
  0x25   :  { %273 = vsyncadd [#allocation5], 4294967040 }
  0x26   :  { %274 = dma.done.wait [#allocation8], 256  }
  0x27   :  { %275 = vsyncadd [#allocation8], 4294967040  ;;  %v284_v0 = vmov 0.0   ;;  %v69_v1 = vld [vmem:[#allocation4] sm:$0xff]  ;;  %v70_v2 = vld [vmem:[#allocation4 + $0x8] sm:$0xff]  ;;  %vm109_vm0 = vcmask 1040384  }
  0x28   :  { %67 = vst [vmem:[#allocation2] sm:$0x1] %v284_v0  ;;  %68 = vst [vmem:[#allocation3] sm:$0x1] %v284_v0  ;;  %v73_v3 = vmul.f32 0.5, %v69_v1  ;;  %v74_v4 = vmul.f32 0.5, %v70_v2 }
  0x29   :  { %v71_v8 = vld [vmem:[#allocation7] sm:$0xff]  ;;  %v72_v10 = vld [vmem:[#allocation7 + $0x8] sm:$0xff]  ;;  %s285_s1 = smov [#allocation9]   ;;  %s286_s12 = smov [#allocation10]  }
  0x2a   :  { %180 = vtanh.f32 %v73_v3  ;;  %s141_s10 = sshll.u32 %s285_s1, 4  ;;  %s151_s13 = sshll.u32 %s286_s12, 4  ;;  %s142_s10 = int_to_ptr.vmem [resolvable:$true] %s141_s10  ;;  %s152_s13 = int_to_ptr.vmem [resolvable:$true] %s151_s13 }
  0x2b   :  { %182 = vtanh.f32 %v74_v4  ;;  %s228_s14 = scalar_lea.vmem %s142_s10, 128  ;;  %p233_p3 = scmp.lt.s32.totalorder %s142_s10, %s142_s10 }
  0x2c   :  { %p229_p2 = scmp.ne.s32.totalorder %s142_s10, %s228_s14  ;;  %p234_p4 = scmp.lt.s32.totalorder %s228_s14, %s228_s14 }
  0x2e   :  { %p235_p5 = por %p234_p4, %p233_p3 }
  0x2f   :  { %v81_v29 = vld [vmem:[#allocation2] sm:$0x1]  ;;  %v93_v30 = vld [vmem:[#allocation3] sm:$0x1] }
  0x30   :  { %p236_p6 = pnand %p235_p5, %p229_p2 }
  0x34   :  { %v181_v5 = vpop.eup %180 }
  0x35   :  { %v183_v6 = vpop.eup %182  ;;  %v77_v7 = vmul.f32 0.5, %v181_v5 }
  0x36   :  { %v78_v9 = vmul.f32 0.5, %v183_v6 }
  0x37   :  { %v79_v11 = vadd.f32 0.5, %v77_v7 }
  0x38   :  { %v80_v12 = vadd.f32 0.5, %v78_v9 }
  0x39   :  { %v82_v13 = vmul.f32 %v79_v11, %v71_v8  ;;  %v94_v14 = vadd.f32 %v79_v11, %v71_v8 }
  0x3a   :  { %v83_v15 = vmul.f32 %v80_v12, %v72_v10  ;;  %v95_v16 = vadd.f32 %v80_v12, %v72_v10 }
  0x3c   :  { %v84_v17 = vadd.f32 %v83_v15, %v82_v13  ;;  %v96_v18 = vadd.f32 %v95_v16, %v94_v14 }
  0x3e   :  { %v85_v19 = vrot.slane %v84_v17, 4  ;;  %v97_v20 = vrot.slane %v96_v18, 4 }
  0x40   :  { %v86_v21 = vadd.f32 %v85_v19, %v84_v17  ;;  %v98_v22 = vadd.f32 %v97_v20, %v96_v18 }
  0x42   :  { %v87_v23 = vrot.slane %v86_v21, 2  ;;  %v99_v24 = vrot.slane %v98_v22, 2 }
  0x44   :  { %v88_v25 = vadd.f32 %v87_v23, %v86_v21  ;;  %v100_v26 = vadd.f32 %v99_v24, %v98_v22 }
  0x46   :  { %v89_v27 = vrot.slane %v88_v25, 1  ;;  %v101_v28 = vrot.slane %v100_v26, 1 }
  0x48   :  { %v90_v31 = vadd.f32 %v89_v27, %v88_v25  ;;  %v102_v32 = vadd.f32 %v101_v28, %v100_v26 }
  0x4a   :  { %v91_v33 = vadd.f32 %v90_v31, %v81_v29  ;;  %v103_v34 = vadd.f32 %v102_v32, %v93_v30 }
  0x4c   :  { %92 = vst [vmem:[#allocation2] sm:$0x1] %v91_v33  ;;  %104 = vst [vmem:[#allocation3] sm:$0x1] %v103_v34 }
  0x53   :  { %v108_v35 = vld [vmem:[#allocation2] sm:$0x1]  ;;  %v122_v36 = vld [vmem:[#allocation3] sm:$0x1] }
  0x54   :  { %v110_v37 = vsel %vm109_vm0, %v108_v35, 0.0  ;;  %v123_v38 = vsel %vm109_vm0, %v122_v36, 0.0 }
  0x55   :  { %111 = vadd.xlane.f32.xlu0 %v110_v37 }
  0x59   :  { %124 = vadd.xlane.f32.xlu0 %v123_v38 }
  0xe2   :  { %v112_v39 = vpop.xlane.xlu0 %111 }
  0xe3   :  { %v113_v40 = vrot.slane %v112_v39, 4 }
  0xe5   :  { %v114_v41 = vadd.f32 %v113_v40, %v112_v39 }
  0xe6   :  { %v125_v42 = vpop.xlane.xlu0 %124 }
  0xe7   :  { %v115_v43 = vrot.slane %v114_v41, 2  ;;  %v126_v44 = vrot.slane %v125_v42, 4 }
  0xe9   :  { %v127_v45 = vadd.f32 %v126_v44, %v125_v42  ;;  %v116_v46 = vadd.f32 %v115_v43, %v114_v41 }
  0xeb   :  { %v128_v47 = vrot.slane %v127_v45, 2  ;;  %v117_v48 = vrot.slane %v116_v46, 1 }
  0xed   :  { %v129_v49 = vadd.f32 %v128_v47, %v127_v45  ;;  %v118_v50 = vadd.f32 %v117_v48, %v116_v46 }
  0xef   :  { %169 = vpush %v118_v50  ;;  %v130_v51 = vrot.slane %v129_v49, 1 }
  0xf1   :  { %v131_v52 = vadd.f32 %v130_v51, %v129_v49 }
  0xf3   :  { %171 = vpush %v131_v52 }
 0x120   :  { %s170_s11 = spop %169 }
 0x121   :  { %v120_v53 = vstv %s170_s11 }
 0x122   :  { %121 = vst [vmem:[#allocation9] sm:$0xff] %v120_v53 }
 0x123   :  { %239 = shalt.err (!%p236_p6)
}
 0x124   :  { %s240_s17 = scalar_lea.hbm %s357_s2, 128 }
 0x125   :  { %p241_p7 = scmp.ne.s32.totalorder %s357_s2, %s240_s17  ;;  %p244_p8 = scmp.lt.u32.totalorder %s240_s17, %s357_s2 }
 0x127   :  { %p246_p9 = pnand %p244_p8, %p241_p7 }
 0x129   :  { %249 = shalt.err (!%p246_p9)
}
 0x12a   :  { %144 = dma.vmem_to_hbm [thread:$0]  %s142_s10, 128, %s357_s2, [#allocation6]  }
 0x12b   :  { %s172_s24 = spop %171  ;;  %s250_s25 = scalar_lea.vmem %s152_s13, 128 }
 0x12c   :  { %v133_v54 = vstv %s172_s24  ;;  %p251_p10 = scmp.ne.s32.totalorder %s152_s13, %s250_s25  ;;  %p255_p11 = scmp.lt.s32.totalorder %s152_s13, %s152_s13 }
 0x12d   :  { %134 = vst [vmem:[#allocation10] sm:$0xff] %v133_v54  ;;  %p256_p12 = scmp.lt.s32.totalorder %s250_s25, %s250_s25 }
 0x12f   :  { %p257_p13 = por %p256_p12, %p255_p11 }
 0x131   :  { %p258_p0 = pnand %p257_p13, %p251_p10 }
 0x133   :  { %261 = shalt.err (!%p258_p0)
}
 0x134   :  { %s262_s28 = scalar_lea.hbm %s358_s3, 128 }
 0x135   :  { %p263_p1 = scmp.ne.s32.totalorder %s358_s3, %s262_s28  ;;  %p266_p2 = scmp.lt.u32.totalorder %s262_s28, %s358_s3 }
 0x137   :  { %p268_p3 = pnand %p266_p2, %p263_p1 }
 0x139   :  { %271 = shalt.err (!%p268_p3)
}
 0x13a   :  { %154 = dma.vmem_to_hbm [thread:$0]  %s152_s13, 128, %s358_s3, [#allocation11]  }
 0x13b   :  { %276 = dma.done.wait [#allocation6], 128  }
 0x13c   :  { %277 = vsyncadd [#allocation6], 4294967168 }
 0x13d   :  { %278 = dma.done.wait [#allocation11], 128  }
 0x13e   :  { %279 = vsyncadd [#allocation11], 4294967168 }
 0x13f   :  { %161 = vsyncpa [#allocation5], 1 }
 0x140   :  { %162 = vsyncpa [#allocation8], 1 }
 0x141   :  { %163 = vsyncpa [#allocation6], 1 }
 0x142   :  { %164 = vsyncpa [#allocation11], 1 }

</bundles_post_ra>
